<compile_context>
chip_gen: v7x
topology: tpu7x:2x2x1
jax: 0.10.0
libtpu: 0.0.40
codegen_flags: <defaults>
</compile_context>

<pallas_src>
import functools

import jax
import jax.numpy as jnp
from jax.experimental import pallas as pl
from jax.experimental.pallas import tpu as pltpu


def _rope_kernel(states_ref, cos_ref, sin_ref, out_ref, *,
                 num_heads, head_dim, heads_per_store):
    """states_ref: (1, H, tS, D); cos/sin: (tS, D); out_ref: (1, tS, H*D)."""
    half = head_dim // 2
    cos = cos_ref[...]                                   # (tS, D)
    sin = sin_ref[...]                                   # (tS, D)
    # rotate_half(x) * sin == roll(x, D//2, lanes) * (sign * sin),
    # sign = [-1]*half ++ [+1]*half.  Fold the sign into the sin tile once per grid
    # step (a single VPU select on a (tS, D) tile; VPU has slack on this HBM-bound kernel).
    lane = jax.lax.broadcasted_iota(jnp.int32, sin.shape, 1)
    sin_s = jnp.where(lane < half, -sin, sin)

    stripe = heads_per_store * head_dim
    # Per-head(-chunk) compute-and-store: only a (tS, D)-sized working set is live at
    # any time (no (H, tS, D) temporaries), so the static loop keeps live ranges
    # bounded and avoids dynamic lane-offset stores.
    for c in range(num_heads // heads_per_store):
        ys = []
        for dh in range(heads_per_store):
            x = states_ref[0, c * heads_per_store + dh]              # (tS, D)
            y = x * cos + pltpu.roll(x, shift=half, axis=1) * sin_s
            ys.append(y.astype(out_ref.dtype))
        # heads_per_store > 1 only when D % 128 != 0: concatenating heads keeps the
        # output store a full-width, lane-dense vst.
        y_blk = ys[0] if heads_per_store == 1 else jnp.concatenate(ys, axis=-1)
        # Per-stripe stores realize transpose(1, 2) + view(B, S, H*D).
        out_ref[0, :, c * stripe:(c + 1) * stripe] = y_blk


def _sublane_pack(itemsize):
    """Full sublane pack for a dtype: 8 for f32, 16 for bf16, 32 for int8/fp8."""
    return max(8, 32 // int(itemsize))


def _choose_seq_tile(S, B, per_row_bytes, pack, budget_bytes, max_seq_tile):
    """Largest pack-aligned seq tile that fits the VMEM budget; prefers a divisor of S."""
    cap = budget_bytes // max(per_row_bytes, 1)
    cap = min(cap, 2048)
    if max_seq_tile is not None:
        cap = min(cap, int(max_seq_tile))
    cap = max(cap, pack)
    if S <= cap:
        tS = S
    else:
        tS = (cap // pack) * pack
        # Prefer a divisor of S (no padded boundary block) if one is close by.
        t = tS
        while t >= max(pack, (tS * 3) // 4):
            if S % t == 0:
                tS = t
                break
            t -= pack
    # v7x has 2 TensorCores: a single-batch call should still expose >= 2 parallel
    # grid steps so both cores get work (extra grid step is ~free on v5e/v6e).
    if B == 1 and tS >= S and S > pack:
        half_s = (S + 1) // 2
        tS = min(S, max(pack, ((half_s + pack - 1) // pack) * pack))
    return tS


def rotary_embedding(states, cos, sin, unsqueeze_dim: int = 1, max_seq_tile=None):
    """Pallas equivalent of RotaryEmbedding.forward (unsqueeze_dim=1 path)."""
    # TODO(synk): unsqueeze_dim != 1 ((B, S, H, D) input) is the same elementwise math
    # plus a plain reshape; only the default unsqueeze_dim=1 layout is implemented.
    assert unsqueeze_dim == 1, "only the default unsqueeze_dim=1 layout is implemented"
    B, H, S, D = states.shape
    assert cos.shape == (S, D) and sin.shape == (S, D)
    assert D % 2 == 0, "head_dim must be even for rotate_half"

    out_dtype = jnp.promote_types(states.dtype, cos.dtype)
    state_isz = jnp.dtype(states.dtype).itemsize
    cs_isz = jnp.dtype(cos.dtype).itemsize

    # Heads per output stripe: when D is not a multiple of 128, pair heads so every
    # output store is a full 128-lane (unmasked) vst.
    hps = 1
    if D % 128 != 0:
        for c in (2, 4, 8, 16):
            if H % c == 0 and (c * D) % 128 == 0:
                hps = c
                break

    # Sequence-tile alignment: full sublane pack of the narrowest dtype in play.
    pack = max(_sublane_pack(state_isz), _sublane_pack(cs_isz))

    # Generation-aware VMEM budget: v7x has 64 MiB physical VMEM, v5e/v6e 128 MiB.
    try:
        vmem_cap = int(getattr(pltpu.get_tpu_info(), "vmem_capacity_bytes", 128 << 20))
    except Exception:
        vmem_cap = 128 << 20
    if vmem_cap <= (80 << 20):            # v7x-class
        budget, limit_cap = 20 << 20, 28 << 20
    else:                                 # v5e / v6e
        budget, limit_cap = 40 << 20, 64 << 20

    # Bytes per sequence row of one tile: double-buffered states-in/out blocks,
    # double-buffered cos/sin blocks, plus in-kernel f32 intermediates
    # (signed-sin tile + per-chunk x / rolled-x / y working set).
    per_row = (4 * H * D * state_isz
               + 4 * D * cs_isz
               + (1 + 3 * hps) * D * 4)

    tS = _choose_seq_tile(S, B, per_row, pack, budget, max_seq_tile)
    n_s = pl.cdiv(S, tS)
    # Batch is the innermost (fastest) grid axis so the cos/sin block index is
    # constant across it and Pallas skips the redundant per-batch refetch.
    grid = (n_s, B)

    blk_bytes = per_row * tS
    vmem_limit = int(min(max(blk_bytes + (4 << 20), 16 << 20), limit_cap))

    kernel = functools.partial(_rope_kernel, num_heads=H, head_dim=D,
                               heads_per_store=hps)
    return pl.pallas_call(
        kernel,
        out_shape=jax.ShapeDtypeStruct((B, S, H * D), out_dtype),
        grid=grid,
        in_specs=[
            pl.BlockSpec((1, H, tS, D), lambda s, b: (b, 0, s, 0)),
            pl.BlockSpec((tS, D), lambda s, b: (s, 0)),
            pl.BlockSpec((tS, D), lambda s, b: (s, 0)),
        ],
        out_specs=pl.BlockSpec((1, tS, H * D), lambda s, b: (b, s, 0)),
        compiler_params=pltpu.CompilerParams(
            dimension_semantics=("parallel", "parallel"),
            vmem_limit_bytes=vmem_limit,
        ),
    )(states, cos, sin)


def _reference(states, cos, sin):
    """Pure-JAX reference mirroring the PyTorch module."""
    B, H, S, D = states.shape
    half = D // 2
    x1 = states[..., :half]
    x2 = states[..., half:]
    rot = jnp.concatenate([-x2, x1], axis=-1)
    out = states * cos + rot * sin                  # cos/sin (S, D) broadcast over (B, H)
    out = jnp.transpose(out, (0, 2, 1, 3))          # (B, S, H, D)
    return out.reshape(B, S, H * D)


def _make_tables(S, D, dtype):
    """Deterministic RoPE tables (standard inverse-frequency construction)."""
    inv_freq = 1.0 / (10000.0 ** (jnp.arange(0, D, 2, dtype=jnp.float32) / D))   # (D/2,)
    pos = jnp.arange(S, dtype=jnp.float32)                                       # (S,)
    freqs = pos[:, None] * inv_freq[None, :]                                     # (S, D/2)
    emb = jnp.concatenate([freqs, freqs], axis=-1)                               # (S, D)
    return jnp.cos(emb).astype(dtype), jnp.sin(emb).astype(dtype)


if __name__ == "__main__":
    key = jax.random.PRNGKey(0)
    cases = [
        # (B, H,  S,   D, states_dtype,  table_dtype,  max_seq_tile, atol)
        (2, 4, 16, 128, jnp.float32, jnp.float32, None, 1e-5),   # base case
        (1, 16, 32, 128, jnp.bfloat16, jnp.float32, None, 1e-2), # dtype promotion, B=1 split
        (2, 4, 40, 128, jnp.float32, jnp.float32, 16, 1e-5),     # cdiv grid w/ padded last block
    ]
    for i, (B, H, S, D, sdt, tdt, mst, atol) in enumerate(cases):
        k = jax.random.fold_in(key, i)
        states = jax.random.normal(k, (B, H, S, D), dtype=jnp.float32).astype(sdt)
        cos, sin = _make_tables(S, D, tdt)

        out = jax.block_until_ready(rotary_embedding(states, cos, sin, max_seq_tile=mst))
        ref = _reference(states, cos, sin)

        assert out.shape == (B, S, H * D), f"shape mismatch in case {i}"
        assert out.dtype == ref.dtype, f"dtype mismatch in case {i}"
        assert jnp.allclose(out.astype(jnp.float32), ref.astype(jnp.float32),
                            atol=atol, rtol=atol), f"value mismatch in case {i}"
    print("KERNEL_OK")
</pallas_src>

<mosaic_0001>
module attributes {stable_mosaic.version = 11 : i64} {
  func.func @_rope_kernel(%arg0: i32, %arg1: i32, %arg2: memref<1x4x16x128xf32, #tpu.memory_space<vmem>>, %arg3: memref<16x128xf32, #tpu.memory_space<vmem>>, %arg4: memref<16x128xf32, #tpu.memory_space<vmem>>, %arg5: memref<1x16x512xf32, #tpu.memory_space<vmem>>) attributes {dimension_semantics = [#tpu.dimension_semantics<parallel>, #tpu.dimension_semantics<parallel>], iteration_bounds = array<i64: 1, 2>, scalar_prefetch = 0 : i64, scratch_operands = 0 : i64, tpu.core_type = #tpu.core_type<tc>, window_params = [{transform_indices = @transform_0, window_bounds = array<i64: 1, 4, 16, 128>}, {transform_indices = @transform_1, window_bounds = array<i64: 16, 128>}, {transform_indices = @transform_2, window_bounds = array<i64: 16, 128>}, {transform_indices = @transform_3, window_bounds = array<i64: 1, 16, 512>}]} {
    %c0 = arith.constant 0 : index
    %c0_0 = arith.constant 0 : index
    %0 = vector.load %arg3[%c0, %c0_0] : memref<16x128xf32, #tpu.memory_space<vmem>>, vector<16x128xf32>
    %c0_1 = arith.constant 0 : index
    %c0_2 = arith.constant 0 : index
    %1 = vector.load %arg4[%c0_1, %c0_2] : memref<16x128xf32, #tpu.memory_space<vmem>>, vector<16x128xf32>
    %2 = tpu.iota {dimensions = array<i32: 1>} : vector<16x128xi32>
    %c64_i32 = arith.constant 64 : i32
    %3 = vector.broadcast %c64_i32 : i32 to vector<16x128xi32>
    %4 = arith.cmpi slt, %2, %3 : vector<16x128xi32>
    %cst = arith.constant 0.000000e+00 : f32
    %5 = vector.broadcast %cst : f32 to vector<16x128xf32>
    %6 = arith.subf %5, %1 : vector<16x128xf32>
    %7 = arith.select %4, %6, %1 : vector<16x128xi1>, vector<16x128xf32>
    %c0_3 = arith.constant 0 : index
    %c0_4 = arith.constant 0 : index
    %c0_5 = arith.constant 0 : index
    %c0_6 = arith.constant 0 : index
    %8 = vector.load %arg2[%c0_3, %c0_4, %c0_5, %c0_6] : memref<1x4x16x128xf32, #tpu.memory_space<vmem>>, vector<1x1x16x128xf32>
    %9 = vector.shape_cast %8 : vector<1x1x16x128xf32> to vector<16x128xf32>
    %10 = arith.mulf %9, %0 : vector<16x128xf32>
    %c64_i32_7 = arith.constant 64 : i32
    %11 = tpu.dynamic_rotate %9 by %c64_i32_7 dim 1 : vector<16x128xf32>, i32 -> vector<16x128xf32>
    %12 = arith.mulf %11, %7 : vector<16x128xf32>
    %13 = arith.addf %10, %12 : vector<16x128xf32>
    %c0_8 = arith.constant 0 : index
    %c0_9 = arith.constant 0 : index
    %c0_10 = arith.constant 0 : index
    %14 = vector.load %arg5[%c0_8, %c0_9, %c0_10] : memref<1x16x512xf32, #tpu.memory_space<vmem>>, vector<1x16x128xf32>
    %15 = vector.shape_cast %14 : vector<1x16x128xf32> to vector<16x128xf32>
    %16 = vector.shape_cast %13 : vector<16x128xf32> to vector<1x16x128xf32>
    tpu.vector_store %arg5[%c0_8, %c0_9, %c0_10], %16 {strides = array<i32>} : memref<1x16x512xf32, #tpu.memory_space<vmem>>, vector<1x16x128xf32>,
    %c0_11 = arith.constant 0 : index
    %c1 = arith.constant 1 : index
    %c0_12 = arith.constant 0 : index
    %c0_13 = arith.constant 0 : index
    %17 = vector.load %arg2[%c0_11, %c1, %c0_12, %c0_13] : memref<1x4x16x128xf32, #tpu.memory_space<vmem>>, vector<1x1x16x128xf32>
    %18 = vector.shape_cast %17 : vector<1x1x16x128xf32> to vector<16x128xf32>
    %19 = arith.mulf %18, %0 : vector<16x128xf32>
    %c64_i32_14 = arith.constant 64 : i32
    %20 = tpu.dynamic_rotate %18 by %c64_i32_14 dim 1 : vector<16x128xf32>, i32 -> vector<16x128xf32>
    %21 = arith.mulf %20, %7 : vector<16x128xf32>
    %22 = arith.addf %19, %21 : vector<16x128xf32>
    %c0_15 = arith.constant 0 : index
    %c0_16 = arith.constant 0 : index
    %c128 = arith.constant 128 : index
    %23 = vector.load %arg5[%c0_15, %c0_16, %c128] : memref<1x16x512xf32, #tpu.memory_space<vmem>>, vector<1x16x128xf32>
    %24 = vector.shape_cast %23 : vector<1x16x128xf32> to vector<16x128xf32>
    %25 = vector.shape_cast %22 : vector<16x128xf32> to vector<1x16x128xf32>
    tpu.vector_store %arg5[%c0_15, %c0_16, %c128], %25 {strides = array<i32>} : memref<1x16x512xf32, #tpu.memory_space<vmem>>, vector<1x16x128xf32>,
    %c0_17 = arith.constant 0 : index
    %c2 = arith.constant 2 : index
    %c0_18 = arith.constant 0 : index
    %c0_19 = arith.constant 0 : index
    %26 = vector.load %arg2[%c0_17, %c2, %c0_18, %c0_19] : memref<1x4x16x128xf32, #tpu.memory_space<vmem>>, vector<1x1x16x128xf32>
    %27 = vector.shape_cast %26 : vector<1x1x16x128xf32> to vector<16x128xf32>
    %28 = arith.mulf %27, %0 : vector<16x128xf32>
    %c64_i32_20 = arith.constant 64 : i32
    %29 = tpu.dynamic_rotate %27 by %c64_i32_20 dim 1 : vector<16x128xf32>, i32 -> vector<16x128xf32>
    %30 = arith.mulf %29, %7 : vector<16x128xf32>
    %31 = arith.addf %28, %30 : vector<16x128xf32>
    %c0_21 = arith.constant 0 : index
    %c0_22 = arith.constant 0 : index
    %c256 = arith.constant 256 : index
    %32 = vector.load %arg5[%c0_21, %c0_22, %c256] : memref<1x16x512xf32, #tpu.memory_space<vmem>>, vector<1x16x128xf32>
    %33 = vector.shape_cast %32 : vector<1x16x128xf32> to vector<16x128xf32>
    %34 = vector.shape_cast %31 : vector<16x128xf32> to vector<1x16x128xf32>
    tpu.vector_store %arg5[%c0_21, %c0_22, %c256], %34 {strides = array<i32>} : memref<1x16x512xf32, #tpu.memory_space<vmem>>, vector<1x16x128xf32>,
    %c0_23 = arith.constant 0 : index
    %c3 = arith.constant 3 : index
    %c0_24 = arith.constant 0 : index
    %c0_25 = arith.constant 0 : index
    %35 = vector.load %arg2[%c0_23, %c3, %c0_24, %c0_25] : memref<1x4x16x128xf32, #tpu.memory_space<vmem>>, vector<1x1x16x128xf32>
    %36 = vector.shape_cast %35 : vector<1x1x16x128xf32> to vector<16x128xf32>
    %37 = arith.mulf %36, %0 : vector<16x128xf32>
    %c64_i32_26 = arith.constant 64 : i32
    %38 = tpu.dynamic_rotate %36 by %c64_i32_26 dim 1 : vector<16x128xf32>, i32 -> vector<16x128xf32>
    %39 = arith.mulf %38, %7 : vector<16x128xf32>
    %40 = arith.addf %37, %39 : vector<16x128xf32>
    %c0_27 = arith.constant 0 : index
    %c0_28 = arith.constant 0 : index
    %c384 = arith.constant 384 : index
    %41 = vector.load %arg5[%c0_27, %c0_28, %c384] : memref<1x16x512xf32, #tpu.memory_space<vmem>>, vector<1x16x128xf32>
    %42 = vector.shape_cast %41 : vector<1x16x128xf32> to vector<16x128xf32>
    %43 = vector.shape_cast %40 : vector<16x128xf32> to vector<1x16x128xf32>
    tpu.vector_store %arg5[%c0_27, %c0_28, %c384], %43 {strides = array<i32>} : memref<1x16x512xf32, #tpu.memory_space<vmem>>, vector<1x16x128xf32>,
    return
  }
  func.func @transform_0(%arg0: i32, %arg1: i32) -> (i32, i32, i32, i32) {
    %c0_i32 = arith.constant 0 : i32
    %c0_i32_0 = arith.constant 0 : i32
    %c0_i32_1 = arith.constant 0 : i32
    return %arg1, %c0_i32, %arg0, %c0_i32_0 : i32, i32, i32, i32
  }
  func.func @transform_1(%arg0: i32, %arg1: i32) -> (i32, i32) {
    %c0_i32 = arith.constant 0 : i32
    %c0_i32_0 = arith.constant 0 : i32
    return %arg0, %c0_i32 : i32, i32
  }
  func.func @transform_2(%arg0: i32, %arg1: i32) -> (i32, i32) {
    %c0_i32 = arith.constant 0 : i32
    %c0_i32_0 = arith.constant 0 : i32
    return %arg0, %c0_i32 : i32, i32
  }
  func.func @transform_3(%arg0: i32, %arg1: i32) -> (i32, i32, i32) {
    %c0_i32 = arith.constant 0 : i32
    %c0_i32_0 = arith.constant 0 : i32
    return %arg1, %arg0, %c0_i32 : i32, i32, i32
  }
}

</mosaic_0001>

<bundles_post_ra>
// kernel: tpu_custom_call.1
= control target key start
LH: loop header
LB: loop body
LE: loop exit
PB: predicated region body
PF: predicated region fallthrough
CT: control target
= control target key end

     0   :  { %8 = vsyncpa [#allocation3], 0  ;;  %s1050_s0 = inlined_call_operand.hbm [shape: f32[2,4,16,128], index: 0, kind: input, shape index: {}]   ;;  %s1051_s1 = inlined_call_operand.hbm [shape: f32[16,128], index: 1, kind: input, shape index: {}]   ;;  %s1052_s2 = inlined_call_operand.hbm [shape: f32[16,128], index: 2, kind: input, shape index: {}]   ;;  %s1053_s3 = inlined_call_operand.hbm [shape: f32[2,16,512], index: 3, kind: output, shape index: {}]  }
   0x1   :  { %10 = vsyncpa [#allocation3 + $0x1], 0 }
   0x2   :  { %11 = vsyncpa [#allocation6], 0 }
   0x3   :  { %12 = vsyncpa [#allocation4], 0 }
   0x4   :  { %14 = vsyncpa [#allocation4 + $0x1], 0  ;;  %s771_s12 = smov 0   ;;  %s773_s13 = smov 0  }
   0x5   :  { %s775_s14 = smov 0   ;;  %s777_s15 = smov 0  }
   0x6   :  { %s779_s16 = smov 0   ;;  %s781_s17 = smov 0  }
   0x7 LB: > { %s453_s18 = sadd.s32 4294967295, %s740_s17   ;;  %s454_s19 = sadd.s32 4294967294, %s740_s17   ;;  %s740_s17 = sphi %s781_s17, %s20_s17   ;;  %s736_s16 = sphi %s779_s16, %s1075_s16   ;;  %s732_s15 = sphi %s777_s15, %s1074_s15   ;;  %s728_s14 = sphi %s775_s14, %s1073_s14   ;;  %s724_s13 = sphi %s773_s13, %s1072_s13   ;;  %s720_s12 = sphi %s771_s12, %s1071_s12  }
   0x8   : > { %p54_p0 = scmp.ne.s32.totalorder %s724_s13, %s720_s12  ;;  %p805_p1 = scmp.eq.s32.totalorder %s453_s18, 0 }
   0x9   : > { %p809_p2 = scmp.eq.s32.totalorder %s453_s18, 1  ;;  %p138_p3 = scmp.eq.s32.totalorder %s454_s19, 1 }
   0xa   : > { %s1058_s20 = scalar_select %p805_p1, 1, 0 }
   0xb   : > { %p815_p4 = por %p805_p1, %p54_p0  ;;  %p455_p5 = scmp.ge.s32.totalorder %s740_s17, 1 }
   0xc   : > { %p820_p6 = por %p138_p3, %p54_p0  ;;  %p145_p7 = scmp.lt.s32.totalorder %s740_s17, 3 }
   0xd   : > { %s1060_s22 = scalar_select %p815_p4, 1, 0 }
   0xe   : > { %s1061_s23 = scalar_select %p820_p6, 1, 0 }
   0xf   : > { %p825_p8 = pnand %p455_p5, %p145_p7  ;;  %s742_s25 = smov [#allocation5]  }
  0x10   : > { %s160_s26 = sshll.u32 %s742_s25, 4  ;;  %s743_s28 = smov [#allocation7]   ;;  %s829_s26 = int_to_ptr.vmem [resolvable:$true] %s160_s26 }
  0x11   : > { %p492_p9 = pneg %p825_p8  ;;  %s176_s29 = sshll.u32 %s743_s28, 4  ;;  %s840_s29 = int_to_ptr.vmem [resolvable:$true] %s176_s29 }
  0x12   : > { %s568_s5 = scalar_lea.hbm %s1051_s1, 256 }
  0x13   : > { %p836_p11 = pnand %p492_p9, %p805_p1  ;;  %p569_p12 = scmp.ne.s32.totalorder %s1051_s1, %s568_s5 }
  0x14   : > { %p575_p5 = scmp.lt.u32.totalorder %s568_s5, %s1051_s1 }
  0x15   : > { %p570_p13 = pneg %p836_p11 }
  0x17   : > { %p571_p0 = pnand %p570_p13, %p569_p12 }
  0x19   : > { %p572_p3 = pneg %p571_p0 }
  0x1b   : > { %p577_p7 = pnand %p575_p5, %p572_p3 }
  0x1d   : > { %580 = shalt.err (!%p577_p7)
}
  0x1e   : > { %s581_s10 = scalar_lea.vmem %s829_s26, 256  ;;  %p589_p1 = scmp.lt.s32.totalorder %s829_s26, %s829_s26 }
  0x1f   : > { %p582_p9 = scmp.ne.s32.totalorder %s829_s26, %s581_s10  ;;  %p590_p12 = scmp.lt.s32.totalorder %s581_s10, %s581_s10 }
  0x21   : > { %p584_p10 = pnand %p582_p9, %p570_p13  ;;  %p591_p0 = por %p590_p12, %p589_p1 }
  0x23   : > { %p585_p6 = pneg %p584_p10 }
  0x25   : > { %p592_p4 = pnand %p591_p0, %p585_p6 }
  0x27   : > { %595 = shalt.err (!%p592_p4)
}
  0x28   : > { %s744_s11 = smov 128   ;;  %s745_s18 = smov 8  }
  0x29   : > { %495 = dma.hbm_to_vmem [thread:$0]  (!%p836_p11), %s1051_s1, 256, %s829_s26, [#allocation6], %s744_s11, %s744_s11, %s745_s18  }
  0x2a   : > { %s596_s4 = scalar_lea.hbm %s1052_s2, 256 }
  0x2b   : > { %p597_p1 = scmp.ne.s32.totalorder %s1052_s2, %s596_s4  ;;  %p603_p10 = scmp.lt.u32.totalorder %s596_s4, %s1052_s2 }
  0x2d   : > { %p599_p4 = pnand %p597_p1, %p570_p13 }
  0x2f   : > { %p600_p6 = pneg %p599_p4 }
  0x31   : > { %p605_p3 = pnand %p603_p10, %p600_p6 }
  0x33   : > { %608 = shalt.err (!%p605_p3)
}
  0x34   : > { %s609_s26 = scalar_lea.vmem %s840_s29, 256  ;;  %p617_p12 = scmp.lt.s32.totalorder %s840_s29, %s840_s29 }
  0x35   : > { %p610_p5 = scmp.ne.s32.totalorder %s840_s29, %s609_s26  ;;  %p618_p0 = scmp.lt.s32.totalorder %s609_s26, %s609_s26 }
  0x37   : > { %p612_p7 = pnand %p610_p5, %p570_p13  ;;  %p619_p1 = por %p618_p0, %p617_p12 }
  0x39   : > { %p613_p9 = pneg %p612_p7 }
  0x3b   : > { %p620_p4 = pnand %p619_p1, %p613_p9 }
  0x3d   : > { %623 = shalt.err (!%p620_p4)
}
  0x3e   : > { %498 = dma.hbm_to_vmem [thread:$0]  (!%p836_p11), %s1052_s2, 256, %s840_s29, [#allocation6], %s744_s11, %s744_s11, %s745_s18  }
  0x3f   : > { %s29_s27 = sadd.s32 1, %s736_s16  ;;  %s41_s19 = sadd.s32 1, %s728_s14 }
  0x40   : > { %p30_p13 = scmp.ge.s32.totalorder %s29_s27, 2  ;;  %p48_p6 = scmp.ne.s32.totalorder %s728_s14, %s724_s13 }
  0x41   : > { %p49_p10 = scmp.eq.s32.totalorder %s740_s17, 0  ;;  %p509_p3 = scmp.lt.s32.totalorder %s740_s17, 2 }
  0x42   : > { %s1077_s27 = smov (%p30_p13, %s29_s27), 0  ;;  %p910_p7 = por %p809_p2, %p48_p6 }
  0x43   : > { %p50_p5 = por %p49_p10, %p48_p6  ;;  %s36_s28 = ssub.s32 %s736_s16, %s1077_s27 }
  0x44   : > { %s1064_s25 = scalar_select %p910_p7, 1, 0 }
  0x45   : > { %s190_s30 = sand.u32 1, %s728_s14   ;;  %p39_p9 = scmp.eq.s32.totalorder %s36_s28, 0 }
  0x46   : > { %s459_s29 = sshll.u32 %s190_s30, 6  ;;  %s478_s4 = sshll.u32 %s736_s16, 10 }
  0x47   : > { %s919_s5 = scalar_select %p39_p9, %s728_s14, %s41_s19  }
  0x48   : > { %s924_s8 = scalar_lea.hbm %s1050_s0, %s478_s4  ;;  %s194_s21 = scalar_lea.vmem [#allocation2], %s459_s29 }
  0x49   : > { %s203_s26 = sshll.u32 %s194_s21, 4  ;;  %p928_p2 = pnand %p509_p3, %p50_p5  ;;  %s932_s26 = int_to_ptr.vmem [resolvable:$true] %s203_s26 }
  0x4a   : > { %s934_s10 = scalar_lea.sflag [#allocation3], %s190_s30  ;;  %s624_s19 = scalar_lea.hbm %s924_s8, 1024 }
  0x4b   : > { %p625_p11 = scmp.ne.s32.totalorder %s924_s8, %s624_s19  ;;  %p626_p12 = pneg %p928_p2 }
  0x4c   : > { %s629_s4 = scalar_lea.hbm %s1050_s0, 2048  ;;  %p630_p4 = scmp.lt.u32.totalorder %s924_s8, %s1050_s0 }
  0x4d   : > { %p627_p0 = pnand %p626_p12, %p625_p11  ;;  %p631_p13 = scmp.lt.u32.totalorder %s629_s4, %s624_s19 }
  0x4e   : > { %p633_p10 = scmp.lt.u32.totalorder %s624_s19, %s924_s8 }
  0x4f   : > { %p628_p1 = pneg %p627_p0  ;;  %p632_p6 = por %p631_p13, %p630_p4 }
  0x51   : > { %p634_p3 = por %p633_p10, %p632_p6 }
  0x53   : > { %p635_p5 = pnand %p634_p3, %p628_p1 }
  0x55   : > { %638 = shalt.err (!%p635_p5)
}
  0x56   : > { %s639_s30 = scalar_lea.vmem %s932_s26, 1024  ;;  %s746_s21 = smov [#allocation2]  }
  0x57   : > { %p640_p9 = scmp.ne.s32.totalorder %s932_s26, %s639_s30  ;;  %s644_s28 = sshll.u32 %s746_s21, 4  ;;  %s645_s28 = int_to_ptr.vmem [resolvable:$false] %s644_s28 }
  0x58   : > { %s646_s29 = scalar_lea.vmem %s645_s28, 2048  ;;  %p647_p7 = scmp.lt.s32.totalorder %s932_s26, %s645_s28 }
  0x59   : > { %p642_p11 = pnand %p640_p9, %p626_p12  ;;  %p648_p4 = scmp.lt.s32.totalorder %s646_s29, %s639_s30 }
  0x5b   : > { %p643_p0 = pneg %p642_p11  ;;  %p649_p13 = por %p648_p4, %p647_p7 }
  0x5d   : > { %p650_p6 = pnand %p649_p13, %p643_p0 }
  0x5f   : > { %653 = shalt.err (!%p650_p6)
}
  0x60   : > { %502 = dma.hbm_to_vmem [thread:$0]  (!%p928_p2), %s924_s8, 1024, %s932_s26, %s934_s10, %s744_s11, %s744_s11, %s745_s18  }
  0x61   : > { %215 = sbr.rel (%p825_p8) target bundleno = 255 (0xff), region = 32  ;;  %s968_s19 = sand.u32 (!%p825_p8), 1, %s724_s13  }
  0x62   : > { %s463_s4 = sshll.u32 (!%p825_p8), %s968_s19, 6  ;;  %s218_s6 = scalar_lea.sflag (!%p825_p8), [#allocation3], %s968_s19 }
  0x63   : > { %s221_s9 = scalar_lea.vmem (!%p825_p8), [#allocation2], %s463_s4  ;;  %p1066_p7 = scmp.ne.s32.totalorder (!%p825_p8), %s1060_s22, 0 }
  0x68   : > { %707 = dma.done.wait (%p1066_p7), %s218_s6, 1024  }
  0x69   : > { %709 = vsyncadd (%p1066_p7), %s218_s6, 4294966272  ;;  %p1067_p2 = scmp.ne.s32.totalorder %s1058_s20, 0 }
  0x6b   : > { %711 = dma.done.wait (%p1067_p2), [#allocation6], 512  }
  0x6c   : > { %713 = vsyncadd (%p1067_p2), [#allocation6], 4294966784  ;;  %v467_v0 = vld [vmem:[%s221_s9 + $0x10] sm:$0xff]  ;;  %v267_v1 = vld [vmem:[%s221_s9] sm:$0xff]  ;;  %s747_s24 = smov 64   ;;  %v260_v8 = vlaneseq  ;;  %s984_s20 = scalar_lea.vmem [#allocation8], %s463_s4 }
  0x6d   : > { %286 = vrot.lane.b32.xlu1 %v467_v0, %s747_s24  ;;  %271 = vrot.lane.b32.xlu0 %v267_v1, %s747_s24  ;;  %v468_v2 = vld [vmem:[%s221_s9 + $0x18] sm:$0xff]  ;;  %v268_v3 = vld [vmem:[%s221_s9 + $0x8] sm:$0xff]  ;;  %v258_v10 = vld [vmem:[#allocation7] sm:$0xff]  ;;  %s343_s22 = sshll.u32 %s984_s20, 4  ;;  %s479_s11 = sshll.u32 %s732_s15, 10  ;;  %s992_s22 = int_to_ptr.vmem [resolvable:$true] %s343_s22 }
  0x6e   : > { %v470_v4 = vld [vmem:[%s221_s9 + $0x28] sm:$0xff]  ;;  %v469_v5 = vld [vmem:[%s221_s9 + $0x20] sm:$0xff]  ;;  %v472_v6 = vld [vmem:[%s221_s9 + $0x38] sm:$0xff]  ;;  %v261_v9 = vand.u32 127, %v260_v8  ;;  %v263_v11 = vsub.f32 0.0, %v258_v10  ;;  %s999_s26 = scalar_lea.hbm %s1053_s3, %s479_s11  ;;  %s327_s15 = scalar_lea.sflag [#allocation4], %s968_s19 }
  0x6f   : > { %v471_v7 = vld [vmem:[%s221_s9 + $0x30] sm:$0xff]  ;;  %v259_v12 = vld [vmem:[#allocation7 + $0x8] sm:$0xff]  ;;  %v256_v13 = vld [vmem:[#allocation5] sm:$0xff]  ;;  %s654_s10 = scalar_lea.vmem %s992_s22, 1024  ;;  %p1068_p12 = scmp.ne.s32.totalorder %s1064_s25, 0 }
  0x70   : > { %vm262_vm0 = vcmp.lt.s32.totalorder %v261_v9, 64  ;;  %v264_v15 = vsub.f32 0.0, %v259_v12  ;;  %v284_v16 = vmul.f32 %v467_v0, %v256_v13  ;;  %v269_v17 = vmul.f32 %v267_v1, %v256_v13  ;;  %v257_v18 = vld [vmem:[#allocation5 + $0x8] sm:$0xff]  ;;  %p655_p8 = scmp.ne.s32.totalorder %s992_s22, %s654_s10  ;;  %s748_s7 = smov [#allocation8]  }
  0x71   : > { %288 = vrot.lane.b32.xlu1 %v468_v2, %s747_s24  ;;  %273 = vrot.lane.b32.xlu0 %v268_v3, %s747_s24  ;;  %v265_v14 = vsel %vm262_vm0, %v263_v11, %v258_v10  ;;  %v285_v24 = vmul.f32 %v468_v2, %v257_v18  ;;  %v270_v25 = vmul.f32 %v268_v3, %v257_v18  ;;  %s658_s30 = sshll.u32 %s748_s7, 4  ;;  %s659_s30 = int_to_ptr.vmem [resolvable:$false] %s658_s30 }
  0x72   : > { %v266_v23 = vsel %vm262_vm0, %v264_v15, %v259_v12  ;;  %v300_v32 = vmul.f32 %v470_v4, %v257_v18  ;;  %v299_v33 = vmul.f32 %v469_v5, %v256_v13  ;;  %v315_v40 = vmul.f32 %v472_v6, %v257_v18  ;;  %p656_p1 = pnand %p655_p8, %p1068_p12  ;;  %s660_s21 = scalar_lea.vmem %s659_s30, 2048 }
  0x73   : > { %v314_v41 = vmul.f32 %v471_v7, %v256_v13  ;;  %p661_p3 = scmp.lt.s32.totalorder %s992_s22, %s659_s30  ;;  %p662_p5 = scmp.lt.s32.totalorder %s660_s21, %s654_s10 }
  0x74   : > { %p657_p10 = pneg %p656_p1 }
  0x75   : > { %303 = vrot.lane.b32.xlu1 %v470_v4, %s747_s24  ;;  %301 = vrot.lane.b32.xlu0 %v469_v5, %s747_s24  ;;  %p663_p9 = por %p662_p5, %p661_p3 }
  0x77   : > { %p664_p11 = pnand %p663_p9, %p657_p10 }
  0x79   : > { %318 = vrot.lane.b32.xlu1 %v472_v6, %s747_s24  ;;  %316 = vrot.lane.b32.xlu0 %v471_v7, %s747_s24 }
  0xdf   : > { %v287_v19 = vpop.permute.xlu1 %286  ;;  %v272_v20 = vpop.permute.xlu0 %271 }
  0xe0   : > { %v290_v21 = vmul.f32 %v287_v19, %v265_v14  ;;  %v275_v22 = vmul.f32 %v272_v20, %v265_v14 }
  0xe2   : > { %v292_v26 = vadd.f32 %v290_v21, %v284_v16  ;;  %v277_v27 = vadd.f32 %v275_v22, %v269_v17 }
  0xe3   : > { %v289_v28 = vpop.permute.xlu1 %288  ;;  %v274_v29 = vpop.permute.xlu0 %273 }
  0xe4   : > { %294 = vst [vmem:[%s984_s20 + $0x8] sm:$0xff] %v292_v26  ;;  %279 = vst [vmem:[%s984_s20] sm:$0xff] %v277_v27  ;;  %v291_v30 = vmul.f32 %v289_v28, %v266_v23  ;;  %v276_v31 = vmul.f32 %v274_v29, %v266_v23 }
  0xe6   : > { %v293_v34 = vadd.f32 %v291_v30, %v285_v24  ;;  %v278_v35 = vadd.f32 %v276_v31, %v270_v25 }
  0xe7   : > { %v304_v36 = vpop.permute.xlu1 %303  ;;  %v302_v37 = vpop.permute.xlu0 %301 }
  0xe8   : > { %295 = vst [vmem:[%s984_s20 + $0x28] sm:$0xff] %v293_v34  ;;  %280 = vst [vmem:[%s984_s20 + $0x20] sm:$0xff] %v278_v35  ;;  %v306_v38 = vmul.f32 %v304_v36, %v266_v23  ;;  %v305_v39 = vmul.f32 %v302_v37, %v265_v14 }
  0xea   : > { %v308_v42 = vadd.f32 %v306_v38, %v300_v32  ;;  %v307_v43 = vadd.f32 %v305_v39, %v299_v33 }
  0xeb   : > { %v319_v44 = vpop.permute.xlu1 %318  ;;  %v317_v45 = vpop.permute.xlu0 %316 }
  0xec   : > { %310 = vst [vmem:[%s984_s20 + $0x30] sm:$0xff] %v308_v42  ;;  %309 = vst [vmem:[%s984_s20 + $0x10] sm:$0xff] %v307_v43  ;;  %v321_v46 = vmul.f32 %v319_v44, %v266_v23  ;;  %v320_v47 = vmul.f32 %v317_v45, %v265_v14 }
  0xee   : > { %v323_v48 = vadd.f32 %v321_v46, %v315_v40  ;;  %v322_v49 = vadd.f32 %v320_v47, %v314_v41 }
  0xf0   : > { %325 = vst [vmem:[%s984_s20 + $0x38] sm:$0xff] %v323_v48  ;;  %324 = vst [vmem:[%s984_s20 + $0x18] sm:$0xff] %v322_v49 }
  0xf1   : > { %667 = shalt.err (!%p664_p11)
}
  0xf2   : > { %s668_s28 = scalar_lea.hbm %s999_s26, 1024  ;;  %s672_s6 = scalar_lea.hbm %s1053_s3, 2048 }
  0xf3   : > { %p669_p0 = scmp.ne.s32.totalorder %s999_s26, %s668_s28  ;;  %p673_p6 = scmp.lt.u32.totalorder %s999_s26, %s1053_s3 }
  0xf4   : > { %p674_p7 = scmp.lt.u32.totalorder %s672_s6, %s668_s28  ;;  %p676_p8 = scmp.lt.u32.totalorder %s668_s28, %s999_s26 }
  0xf5   : > { %p670_p4 = pnand %p669_p0, %p1068_p12 }
  0xf6   : > { %p675_p2 = por %p674_p7, %p673_p6 }
  0xf7   : > { %p671_p13 = pneg %p670_p4 }
  0xf8   : > { %p677_p1 = por %p676_p8, %p675_p2 }
  0xfa   : > { %p678_p10 = pnand %p677_p1, %p671_p13 }
  0xfc   : > { %681 = shalt.err (!%p678_p10)
}
  0xfd   : > { %s749_s20 = smov 512   ;;  %s750_s11 = smov 32  }
  0xfe   : > { %490 = dma.vmem_to_hbm [thread:$0]  (%p1068_p12), %s992_s22, 1024, %s999_s26, %s327_s15, %s749_s20, %s749_s20, %s750_s11  }
  0xff PF: > { %s358_s18 = sand.u32 1, %s720_s12   ;;  %p1069_p3 = scmp.ne.s32.totalorder %s1061_s23, 0 }
 0x100   : > { %p1070_p5 = scmp.ge.s32.totalorder %s740_s17, 2  ;;  %s359_s8 = scalar_lea.sflag [#allocation4], %s358_s18 }
 0x102   : > { %p504_p9 = pnand %p1070_p5, %p1069_p3 }
 0x104   : > { %715 = dma.done.wait (!%p504_p9), %s359_s8, 1024  }
 0x105   : > { %717 = vsyncadd (!%p504_p9), %s359_s8, 4294966272  ;;  %s20_s17 = sadd.s32 1, %s740_s17   ;;  %s1071_s12 = smov %s724_s13 }
 0x106   : > { %p17_p11 = scmp.ge.s32.totalorder %s20_s17, 4   ;;  %s1072_s13 = smov %s728_s14 }
 0x107   : > { %s1073_s14 = smov %s919_s5  ;;  %s1074_s15 = smov %s736_s16 }
 0x108   : > { %s1075_s16 = smov %s1077_s27  ;;  %19 = sbr.rel (!%p17_p11) target bundleno = 7 (0x7), region = 90 }
 0x10f   :  { %364 = vsyncpa [#allocation3], 1 }
 0x110   :  { %366 = vsyncpa [#allocation3 + $0x1], 1 }
 0x111   :  { %367 = vsyncpa [#allocation6], 1 }
 0x112   :  { %368 = vsyncpa [#allocation4], 1 }
 0x113   :  { %370 = vsyncpa [#allocation4 + $0x1], 1 }

</bundles_post_ra>
